<compile_context>
chip_gen: v7x
topology: tpu7x:2x2x1
jax: 0.10.0
libtpu: 0.0.40
codegen_flags: <defaults>
</compile_context>

<pallas_src>
import functools
import math

import jax
import jax.numpy as jnp
from jax.experimental import pallas as pl
from jax.experimental.pallas import tpu as pltpu

H = 128  # hidden width (fixed by the module)
_HALF_LOG_2PI = 0.5 * math.log(2.0 * math.pi)


def _round_up(x, m):
    return ((x + m - 1) // m) * m


def _acn_kernel(state_ref, noise_ref, w_ref, row_ref, out_ref, *, s_pad, act_dim):
    """One grid step: TB batch rows, all weights resident in VMEM.

    Packed weight slab (bf16), 256 lanes wide:
      rows [0        : s_pad     ]  [ w_fc1 | 0 ]                           (s_pad, 256)
      rows [s_pad    : s_pad+128 ]  [ w_actor_fc | w_critic_fc ]            (128,   256)
      rows [s_pad+128: s_pad+384 ]  cols 0:128 = head weights, cols 128:256 = 0:
                                    rows 0:128 cols 0:A   = w_actor_out
                                    rows 128:256 col 2A   = w_critic_out
    Packed row (f32, 1 x 896 lanes):
      [0:128]   b_fc1
      [128:384] b_actor_fc, b_critic_fc
      [384:512] head bias: b_actor_out at 0:A, b_critic_out at 2A, 0 else
      [512:640] std at 0:A, 0 else
      [640:768] (-log(std) - 0.5*log(2*pi)) at 0:A, 0 else
      [768:896] actor-lane mask: 1.0 at 0:A, 0 else
    """
    x = state_ref[...]                                      # (TB, s_pad) bf16

    # shared encoder
    w1 = w_ref[:s_pad, :H]                                  # (s_pad, 128) bf16
    b1 = row_ref[:, 0:H]                                    # (1, 128) f32
    h0 = jnp.maximum(
        jnp.dot(x, w1, preferred_element_type=jnp.float32) + b1, 0.0)       # (TB, 128) f32

    # fused actor/critic hidden layer: one (128, 256) matmul
    wh = w_ref[s_pad:s_pad + H, :]                          # (128, 256) bf16
    bh = row_ref[:, H:3 * H]                                # (1, 256) f32
    h1 = jnp.maximum(
        jnp.dot(h0.astype(jnp.bfloat16), wh,
                preferred_element_type=jnp.float32) + bh, 0.0)               # (TB, 256) f32

    # fused output heads: one (256, 128) matmul -> mean at lanes 0:A, value at lane 2A
    wo = w_ref[s_pad + H:s_pad + 3 * H, :H]                 # (256, 128) bf16
    bo = row_ref[:, 3 * H:4 * H]                            # (1, 128) f32
    heads = jnp.dot(h1.astype(jnp.bfloat16), wo,
                    preferred_element_type=jnp.float32) + bo                 # (TB, 128) f32

    std_row = row_ref[:, 4 * H:5 * H]                       # std at 0:A, 0 elsewhere
    c_row = row_ref[:, 5 * H:6 * H]                         # -log(std)-0.5*log(2pi) at 0:A
    act_mask = row_ref[:, 6 * H:7 * H]                      # 1.0 at 0:A, 0 elsewhere

    eps = noise_ref[...].astype(jnp.float32)                # (TB, 128), 0 beyond lane A

    mean = heads * act_mask                                 # mean at 0:A, 0 elsewhere
    value_vec = heads - mean                                # value at 2A, 0 elsewhere
    action = jnp.clip(mean + std_row * eps, -1.0, 1.0)      # lanes >= A are clip(0) = 0
    log_prob = pltpu.roll(-0.5 * eps * eps + c_row, shift=act_dim, axis=1)   # -> lanes A:2A

    # single lane-dense 128-lane output block, unmasked store
    out_ref[...] = action + log_prob + value_vec


def pack_params(params):
    """Pack per-layer parameters (weights stored (in, out)) into one bf16 weight slab
    and one f32 bias/std/const row."""
    S = params["w_fc1"].shape[0]
    A = params["w_actor_out"].shape[1]
    # TODO(synk): for action_dim with 2*A+1 > 128 the packed single-block output layout
    # would need a second 128-lane block; not needed for this module's typical sizes.
    assert 2 * A + 1 <= H, "packed output layout requires 2*action_dim + 1 <= 128"
    s_pad = _round_up(S, 16)  # bf16 sublane tile is 16

    w = jnp.zeros((s_pad + 3 * H, 2 * H), jnp.float32)
    w = w.at[:S, :H].set(params["w_fc1"])
    w = w.at[s_pad:s_pad + H, :H].set(params["w_actor_fc"])
    w = w.at[s_pad:s_pad + H, H:].set(params["w_critic_fc"])
    w = w.at[s_pad + H:s_pad + 2 * H, :A].set(params["w_actor_out"])
    w = w.at[s_pad + 2 * H:s_pad + 3 * H, 2 * A:2 * A + 1].set(params["w_critic_out"])
    w = w.astype(jnp.bfloat16)

    row = jnp.zeros((1, 7 * H), jnp.float32)
    row = row.at[:, 0:H].set(params["b_fc1"])
    row = row.at[:, H:2 * H].set(params["b_actor_fc"])
    row = row.at[:, 2 * H:3 * H].set(params["b_critic_fc"])
    row = row.at[:, 3 * H:3 * H + A].set(params["b_actor_out"])
    row = row.at[:, 3 * H + 2 * A:3 * H + 2 * A + 1].set(params["b_critic_out"])
    row = row.at[:, 4 * H:4 * H + A].set(params["std"])
    row = row.at[:, 5 * H:5 * H + A].set(-jnp.log(params["std"]) - _HALF_LOG_2PI)
    row = row.at[:, 6 * H:6 * H + A].set(jnp.ones((1, A), jnp.float32))

    return {"w": w, "row": row, "state_dim": S, "state_pad": s_pad, "action_dim": A}


def actor_critic_forward(state, noise, packed):
    """Full forward pass. state: (B, state_dim), noise: (B, action_dim) ~ N(0,1)."""
    B = state.shape[0]
    S, s_pad, A = packed["state_dim"], packed["state_pad"], packed["action_dim"]

    # Batch tiling:
    #   small B      -> single tile
    #   moderate B   -> >= 2 tiles so both TensorCores on v7x get work
    #   huge B       -> 512-row tiles (amortizes ~0.35 us/step, ~85% of HBM roofline)
    if B <= 128:
        TB = _round_up(B, 16)
    elif B <= 1024:
        TB = _round_up((B + 1) // 2, 16)
    else:
        TB = 512
    B_pad = _round_up(B, TB)

    state_b = state.astype(jnp.bfloat16)
    if state_b.shape == (B_pad, s_pad):
        state_p = state_b                                   # no pad round-trip needed
    else:
        state_p = jnp.zeros((B_pad, s_pad), jnp.bfloat16).at[:B, :S].set(state_b)

    noise_b = noise.astype(jnp.bfloat16)
    if noise_b.shape == (B_pad, H):
        noise_p = noise_b
    else:
        noise_p = jnp.zeros((B_pad, H), jnp.bfloat16).at[:B, :A].set(noise_b)

    kernel = functools.partial(_acn_kernel, s_pad=s_pad, act_dim=A)
    out = pl.pallas_call(
        kernel,
        out_shape=jax.ShapeDtypeStruct((B_pad, H), jnp.float32),
        grid_spec=pltpu.PrefetchScalarGridSpec(
            num_scalar_prefetch=0,
            grid=(B_pad // TB,),
            in_specs=[
                pl.BlockSpec((TB, s_pad), lambda i: (i, 0)),               # state tile
                pl.BlockSpec((TB, H), lambda i: (i, 0)),                   # noise tile
                pl.BlockSpec((s_pad + 3 * H, 2 * H), lambda i: (0, 0)),    # weights (resident)
                pl.BlockSpec((1, 7 * H), lambda i: (0, 0)),                # bias/std/const row
            ],
            out_specs=pl.BlockSpec((TB, H), lambda i: (i, 0)),
        ),
        compiler_params=pltpu.CompilerParams(
            dimension_semantics=("parallel",)),
    )(state_p, noise_p, packed["w"], packed["row"])

    action = out[:B, 0:A]
    log_prob = out[:B, A:2 * A]
    value = out[:B, 2 * A:2 * A + 1]
    return action, log_prob, value


def init_params(key, state_dim, action_dim):
    """Mirror the PyTorch module's reset_parameters().

    hidden_init() uses weight.size()[0] == out_features (128) for the hidden layers,
    so their weight bound is 1/sqrt(128). Biases keep PyTorch Linear's default
    U(-1/sqrt(in_features), 1/sqrt(in_features)). Weights stored (in, out).
    """
    ks = jax.random.split(key, 10)
    lim_h = 1.0 / math.sqrt(H)

    def u(k, shape, lo, hi):
        return jax.random.uniform(k, shape, jnp.float32, lo, hi)

    return {
        "w_fc1":        u(ks[0], (state_dim, H), -lim_h, lim_h),
        "b_fc1":        u(ks[1], (1, H), -1.0 / math.sqrt(state_dim),
                          1.0 / math.sqrt(state_dim)),
        "w_actor_fc":   u(ks[2], (H, H), -lim_h, lim_h),
        "b_actor_fc":   u(ks[3], (1, H), -lim_h, lim_h),
        "w_actor_out":  u(ks[4], (H, action_dim), -0.003, 0.003),
        "b_actor_out":  u(ks[5], (1, action_dim), -lim_h, lim_h),
        "std":          jnp.ones((1, action_dim), jnp.float32),
        "w_critic_fc":  u(ks[6], (H, H), -lim_h, lim_h),
        "b_critic_fc":  u(ks[7], (1, H), -lim_h, lim_h),
        "w_critic_out": u(ks[8], (H, 1), -0.003, 0.003),
        "b_critic_out": u(ks[9], (1, 1), -lim_h, lim_h),
    }


def _ref_forward(state, noise, p):
    """Pure-JAX reference (high-precision f32 matmuls) for a correctness check."""
    hp = jax.lax.Precision.HIGHEST
    x = jnp.maximum(jnp.dot(state, p["w_fc1"], precision=hp) + p["b_fc1"], 0.0)
    ha = jnp.maximum(jnp.dot(x, p["w_actor_fc"], precision=hp) + p["b_actor_fc"], 0.0)
    mean = jnp.dot(ha, p["w_actor_out"], precision=hp) + p["b_actor_out"]
    std = p["std"]
    action = mean + std * noise
    logp = -0.5 * noise * noise - jnp.log(std) - _HALF_LOG_2PI
    hc = jnp.maximum(jnp.dot(x, p["w_critic_fc"], precision=hp) + p["b_critic_fc"], 0.0)
    value = jnp.dot(hc, p["w_critic_out"], precision=hp) + p["b_critic_out"]
    return jnp.clip(action, -1.0, 1.0), logp, value


if __name__ == "__main__":
    B, STATE_DIM, ACTION_DIM = 8, 16, 4

    key = jax.random.PRNGKey(0)
    k_state, k_noise, k_params = jax.random.split(key, 3)

    state = jax.random.normal(k_state, (B, STATE_DIM), jnp.float32)
    # TODO(synk): torch.distributions.Normal.sample()'s RNG has no in-kernel equivalent;
    # we draw eps ~ N(0,1) here and reparameterize (action = mean + std * eps).
    noise = jax.random.normal(k_noise, (B, ACTION_DIM), jnp.float32)

    params = init_params(k_params, STATE_DIM, ACTION_DIM)
    packed = pack_params(params)

    action, log_prob, value = actor_critic_forward(state, noise, packed)
    jax.block_until_ready((action, log_prob, value))

    # sanity checks: shapes, clamp range, match vs. pure-JAX reference
    assert action.shape == (B, ACTION_DIM)
    assert log_prob.shape == (B, ACTION_DIM)
    assert value.shape == (B, 1)
    assert bool(jnp.all(action <= 1.0)) and bool(jnp.all(action >= -1.0))

    a_ref, lp_ref, v_ref = _ref_forward(state, noise, params)
    assert bool(jnp.allclose(action, a_ref, atol=1e-2, rtol=1e-2))
    assert bool(jnp.allclose(log_prob, lp_ref, atol=1e-2, rtol=1e-2))
    assert bool(jnp.allclose(value, v_ref, atol=1e-2, rtol=1e-2))

    print("KERNEL_OK")
</pallas_src>

<mosaic_0001>
module attributes {stable_mosaic.version = 11 : i64} {
  func.func @_acn_kernel(%arg0: i32, %arg1: memref<16x16xbf16, #tpu.memory_space<vmem>>, %arg2: memref<16x128xbf16, #tpu.memory_space<vmem>>, %arg3: memref<400x256xbf16, #tpu.memory_space<vmem>>, %arg4: memref<1x896xf32, #tpu.memory_space<vmem>>, %arg5: memref<16x128xf32, #tpu.memory_space<vmem>>) attributes {dimension_semantics = [#tpu.dimension_semantics<parallel>], iteration_bounds = array<i64: 1>, scalar_prefetch = 0 : i64, scratch_operands = 0 : i64, tpu.core_type = #tpu.core_type<tc>, window_params = [{transform_indices = @transform_0, window_bounds = array<i64: 16, 16>}, {transform_indices = @transform_1, window_bounds = array<i64: 16, 128>}, {pipeline_mode = #tpu.pipeline_mode<synchronous>, transform_indices = @transform_2, window_bounds = array<i64: 400, 256>}, {pipeline_mode = #tpu.pipeline_mode<synchronous>, transform_indices = @transform_3, window_bounds = array<i64: 1, 896>}, {transform_indices = @transform_4, window_bounds = array<i64: 16, 128>}]} {
    %c0 = arith.constant 0 : index
    %c0_0 = arith.constant 0 : index
    %0 = vector.load %arg1[%c0, %c0_0] : memref<16x16xbf16, #tpu.memory_space<vmem>>, vector<16x16xbf16>
    %c0_1 = arith.constant 0 : index
    %c0_2 = arith.constant 0 : index
    %1 = vector.load %arg3[%c0_1, %c0_2] : memref<400x256xbf16, #tpu.memory_space<vmem>>, vector<16x128xbf16>
    %c0_3 = arith.constant 0 : index
    %c0_4 = arith.constant 0 : index
    %2 = vector.load %arg4[%c0_3, %c0_4] : memref<1x896xf32, #tpu.memory_space<vmem>>, vector<1x128xf32>
    %cst = arith.constant dense<0.000000e+00> : vector<16x128xf32>
    %3 = tpu.matmul %0, %1, %cst {dimension_numbers = #tpu.dot_dimension_numbers<[1], [0], [0], [1], [0, 0, 1, 1], [], []>} : vector<16x16xbf16>, vector<16x128xbf16>, vector<16x128xf32> -> vector<16x128xf32>
    %4 = vector.broadcast %2 : vector<1x128xf32> to vector<16x128xf32>
    %5 = arith.addf %3, %4 : vector<16x128xf32>
    %cst_5 = arith.constant 0.000000e+00 : f32
    %6 = vector.broadcast %cst_5 : f32 to vector<16x128xf32>
    %7 = arith.maximumf %5, %6 : vector<16x128xf32>
    %c16 = arith.constant 16 : index
    %c0_6 = arith.constant 0 : index
    %8 = vector.load %arg3[%c16, %c0_6] : memref<400x256xbf16, #tpu.memory_space<vmem>>, vector<128x256xbf16>
    %c0_7 = arith.constant 0 : index
    %c128 = arith.constant 128 : index
    %9 = vector.load %arg4[%c0_7, %c128] : memref<1x896xf32, #tpu.memory_space<vmem>>, vector<1x256xf32>
    %10 = arith.truncf %7 : vector<16x128xf32> to vector<16x128xbf16>
    %cst_8 = arith.constant dense<0.000000e+00> : vector<16x256xf32>
    %11 = tpu.matmul %10, %8, %cst_8 {dimension_numbers = #tpu.dot_dimension_numbers<[1], [0], [0], [1], [0, 0, 1, 1], [], []>} : vector<16x128xbf16>, vector<128x256xbf16>, vector<16x256xf32> -> vector<16x256xf32>
    %12 = vector.broadcast %9 : vector<1x256xf32> to vector<16x256xf32>
    %13 = arith.addf %11, %12 : vector<16x256xf32>
    %cst_9 = arith.constant 0.000000e+00 : f32
    %14 = vector.broadcast %cst_9 : f32 to vector<16x256xf32>
    %15 = arith.maximumf %13, %14 : vector<16x256xf32>
    %c144 = arith.constant 144 : index
    %c0_10 = arith.constant 0 : index
    %16 = vector.load %arg3[%c144, %c0_10] : memref<400x256xbf16, #tpu.memory_space<vmem>>, vector<256x128xbf16>
    %c0_11 = arith.constant 0 : index
    %c384 = arith.constant 384 : index
    %17 = vector.load %arg4[%c0_11, %c384] : memref<1x896xf32, #tpu.memory_space<vmem>>, vector<1x128xf32>
    %18 = arith.truncf %15 : vector<16x256xf32> to vector<16x256xbf16>
    %cst_12 = arith.constant dense<0.000000e+00> : vector<16x128xf32>
    %19 = tpu.matmul %18, %16, %cst_12 {dimension_numbers = #tpu.dot_dimension_numbers<[1], [0], [0], [1], [0, 0, 1, 1], [], []>} : vector<16x256xbf16>, vector<256x128xbf16>, vector<16x128xf32> -> vector<16x128xf32>
    %20 = vector.broadcast %17 : vector<1x128xf32> to vector<16x128xf32>
    %21 = arith.addf %19, %20 : vector<16x128xf32>
    %c0_13 = arith.constant 0 : index
    %c512 = arith.constant 512 : index
    %22 = vector.load %arg4[%c0_13, %c512] : memref<1x896xf32, #tpu.memory_space<vmem>>, vector<1x128xf32>
    %c0_14 = arith.constant 0 : index
    %c640 = arith.constant 640 : index
    %23 = vector.load %arg4[%c0_14, %c640] : memref<1x896xf32, #tpu.memory_space<vmem>>, vector<1x128xf32>
    %c0_15 = arith.constant 0 : index
    %c768 = arith.constant 768 : index
    %24 = vector.load %arg4[%c0_15, %c768] : memref<1x896xf32, #tpu.memory_space<vmem>>, vector<1x128xf32>
    %c0_16 = arith.constant 0 : index
    %c0_17 = arith.constant 0 : index
    %25 = vector.load %arg2[%c0_16, %c0_17] : memref<16x128xbf16, #tpu.memory_space<vmem>>, vector<16x128xbf16>
    %26 = arith.extf %25 : vector<16x128xbf16> to vector<16x128xf32>
    %27 = vector.broadcast %24 : vector<1x128xf32> to vector<16x128xf32>
    %28 = arith.mulf %21, %27 : vector<16x128xf32>
    %29 = arith.subf %21, %28 : vector<16x128xf32>
    %30 = vector.broadcast %22 : vector<1x128xf32> to vector<16x128xf32>
    %31 = arith.mulf %30, %26 : vector<16x128xf32>
    %32 = arith.addf %28, %31 : vector<16x128xf32>
    %cst_18 = arith.constant -1.000000e+00 : f32
    %cst_19 = arith.constant 1.000000e+00 : f32
    %33 = vector.broadcast %cst_18 : f32 to vector<16x128xf32>
    %34 = arith.maximumf %33, %32 : vector<16x128xf32>
    %35 = vector.broadcast %cst_19 : f32 to vector<16x128xf32>
    %36 = arith.minimumf %35, %34 : vector<16x128xf32>
    %cst_20 = arith.constant -5.000000e-01 : f32
    %37 = vector.broadcast %cst_20 : f32 to vector<16x128xf32>
    %38 = arith.mulf %37, %26 : vector<16x128xf32>
    %39 = arith.mulf %38, %26 : vector<16x128xf32>
    %40 = vector.broadcast %23 : vector<1x128xf32> to vector<16x128xf32>
    %41 = arith.addf %39, %40 : vector<16x128xf32>
    %c4_i32 = arith.constant 4 : i32
    %42 = tpu.dynamic_rotate %41 by %c4_i32 dim 1 : vector<16x128xf32>, i32 -> vector<16x128xf32>
    %43 = arith.addf %36, %42 : vector<16x128xf32>
    %44 = arith.addf %43, %29 : vector<16x128xf32>
    %c0_21 = arith.constant 0 : index
    %c0_22 = arith.constant 0 : index
    %45 = vector.load %arg5[%c0_21, %c0_22] : memref<16x128xf32, #tpu.memory_space<vmem>>, vector<16x128xf32>
    tpu.vector_store %arg5[%c0_21, %c0_22], %44 {strides = array<i32>} : memref<16x128xf32, #tpu.memory_space<vmem>>, vector<16x128xf32>,
    return
  }
  func.func @transform_0(%arg0: i32) -> (i32, i32) {
    %c0_i32 = arith.constant 0 : i32
    %c0_i32_0 = arith.constant 0 : i32
    return %arg0, %c0_i32 : i32, i32
  }
  func.func @transform_1(%arg0: i32) -> (i32, i32) {
    %c0_i32 = arith.constant 0 : i32
    %c0_i32_0 = arith.constant 0 : i32
    return %arg0, %c0_i32 : i32, i32
  }
  func.func @transform_2(%arg0: i32) -> (i32, i32) {
    %c0_i32 = arith.constant 0 : i32
    %c0_i32_0 = arith.constant 0 : i32
    %c0_i32_1 = arith.constant 0 : i32
    return %c0_i32, %c0_i32_0 : i32, i32
  }
  func.func @transform_3(%arg0: i32) -> (i32, i32) {
    %c0_i32 = arith.constant 0 : i32
    %c0_i32_0 = arith.constant 0 : i32
    %c0_i32_1 = arith.constant 0 : i32
    return %c0_i32, %c0_i32_0 : i32, i32
  }
  func.func @transform_4(%arg0: i32) -> (i32, i32) {
    %c0_i32 = arith.constant 0 : i32
    %c0_i32_0 = arith.constant 0 : i32
    return %arg0, %c0_i32 : i32, i32
  }
}

</mosaic_0001>

<bundles_post_ra>
// kernel: tpu_custom_call.1
= control target key start
LH: loop header
LB: loop body
LE: loop exit
PB: predicated region body
PF: predicated region fallthrough
CT: control target
= control target key end

     0   :  { %9 = vsyncpa [#allocation3], 0  ;;  %s876_s0 = inlined_call_operand.hbm [shape: bf16[16,16], index: 0, kind: input, shape index: {}]   ;;  %s877_s1 = inlined_call_operand.hbm [shape: bf16[16,128], index: 1, kind: input, shape index: {}]   ;;  %s878_s2 = inlined_call_operand.hbm [shape: bf16[400,256], index: 2, kind: input, shape index: {}]   ;;  %s879_s3 = inlined_call_operand.vmem [shape: f32[1,896], index: 3, kind: input, shape index: {}]   ;;  %s880_s4 = inlined_call_operand.hbm [shape: f32[16,128], index: 4, kind: output, shape index: {}]  }
   0x1   :  { %10 = vsyncpa [#allocation6], 0 }
   0x2   :  { %11 = vsyncpa [#allocation4], 0  ;;  %s757_s15 = smov [#allocation5]   ;;  %s758_s17 = smov [#allocation2]  }
   0x3   :  { %s29_s16 = sshll.u32 %s757_s15, 4  ;;  %s17_s18 = sshll.u32 %s758_s17, 4  ;;  %s30_s16 = int_to_ptr.vmem [resolvable:$true] %s29_s16  ;;  %s793_s18 = int_to_ptr.vmem [resolvable:$true] %s17_s18 }
   0x4   :  { %s663_s21 = scalar_lea.hbm %s877_s1, 128 }
   0x5   :  { %p664_p0 = scmp.ne.s32.totalorder %s877_s1, %s663_s21  ;;  %p667_p1 = scmp.lt.u32.totalorder %s663_s21, %s877_s1 }
   0x7   :  { %p669_p2 = pnand %p667_p1, %p664_p0 }
   0x9   :  { %672 = shalt.err (!%p669_p2)
}
   0xa   :  { %s673_s26 = scalar_lea.vmem %s30_s16, 128  ;;  %p678_p4 = scmp.lt.s32.totalorder %s30_s16, %s30_s16 }
   0xb   :  { %p674_p3 = scmp.ne.s32.totalorder %s30_s16, %s673_s26  ;;  %p679_p5 = scmp.lt.s32.totalorder %s673_s26, %s673_s26 }
   0xd   :  { %p680_p6 = por %p679_p5, %p678_p4 }
   0xf   :  { %p681_p7 = pnand %p680_p6, %p674_p3 }
  0x11   :  { %684 = shalt.err (!%p681_p7)
}
  0x12   :  { %s759_s27 = smov 64   ;;  %s760_s28 = smov 4  }
  0x13   :  { %35 = dma.hbm_to_vmem [thread:$0]  %s877_s1, 128, %s30_s16, [#allocation6], %s759_s27, %s759_s27, %s760_s28  }
  0x14   :  { %s685_s7 = scalar_lea.hbm %s876_s0, 128 }
  0x15   :  { %p686_p8 = scmp.ne.s32.totalorder %s876_s0, %s685_s7  ;;  %p689_p9 = scmp.lt.u32.totalorder %s685_s7, %s876_s0 }
  0x17   :  { %p691_p10 = pnand %p689_p9, %p686_p8 }
  0x19   :  { %694 = shalt.err (!%p691_p10)
}
  0x1a   :  { %s695_s12 = scalar_lea.vmem %s793_s18, 128  ;;  %p700_p12 = scmp.lt.s32.totalorder %s793_s18, %s793_s18 }
  0x1b   :  { %p696_p11 = scmp.ne.s32.totalorder %s793_s18, %s695_s12  ;;  %p701_p13 = scmp.lt.s32.totalorder %s695_s12, %s695_s12 }
  0x1d   :  { %p702_p0 = por %p701_p13, %p700_p12 }
  0x1f   :  { %p703_p1 = pnand %p702_p0, %p696_p11 }
  0x21   :  { %706 = shalt.err (!%p703_p1)
}
  0x22   :  { %23 = dma.hbm_to_vmem [thread:$0]  %s876_s0, 128, %s793_s18, [#allocation3], %s759_s27, %s759_s27, %s760_s28  }
  0x23   :  { %s761_s14 = smov [#allocation7]   ;;  %s707_s19 = scalar_lea.hbm %s878_s2, 6400 }
  0x24   :  { %s41_s15 = sshll.u32 %s761_s14, 4  ;;  %p708_p2 = scmp.ne.s32.totalorder %s878_s2, %s707_s19  ;;  %s42_s15 = int_to_ptr.vmem [resolvable:$true] %s41_s15 }
  0x25   :  { %p711_p3 = scmp.lt.u32.totalorder %s707_s19, %s878_s2 }
  0x27   :  { %p713_p4 = pnand %p711_p3, %p708_p2 }
  0x29   :  { %716 = shalt.err (!%p713_p4)
}
  0x2a   :  { %s717_s24 = scalar_lea.vmem %s42_s15, 6400  ;;  %p722_p6 = scmp.lt.s32.totalorder %s42_s15, %s42_s15 }
  0x2b   :  { %p718_p5 = scmp.ne.s32.totalorder %s42_s15, %s717_s24  ;;  %p723_p7 = scmp.lt.s32.totalorder %s717_s24, %s717_s24 }
  0x2d   :  { %p724_p8 = por %p723_p7, %p722_p6 }
  0x2f   :  { %p725_p9 = pnand %p724_p8, %p718_p5 }
  0x31   :  { %728 = shalt.err (!%p725_p9)
}
  0x32   :  { %s762_s0 = smov 128   ;;  %s763_s18 = smov 8  }
  0x33   :  { %47 = dma.hbm_to_vmem [thread:$0]  %s878_s2, 6400, %s42_s15, [#allocation6], %s762_s0, %s762_s0, %s763_s18  }
  0x34   :  { %751 = dma.done.wait [#allocation3], 128  }
  0x35   :  { %752 = vsyncadd [#allocation3], 4294967168 }
  0x36   :  { %753 = dma.done.wait [#allocation6], 6528  }
  0x37   :  { %754 = vsyncadd [#allocation6], 4294960768  ;;  %v764_v0 = vmov 0.0   ;;  %vm765_vm0 = vmmov 0   ;;  %v621_v1 = vld [vmem:[#allocation7] ss:$8 sps:$4 sm:$0xff]   ;;  %v148_v56 = vlaneseq }
  0x38   :  { %604 = vmatprep.subr.bf16.mxu0 %v764_v0  ;;  %606 = vmatprep.mubr.msk.bf16.mxu0 %vm765_vm0, %v764_v0  ;;  %v622_v2 = vld [vmem:[#allocation2] sm:$0xff]   ;;  %vm82_vm1 = vcmask 130048   ;;  %v626_v5 = vld [vmem:[#allocation7 + $0x24] ss:$8 sps:$4 sm:$0xff]   ;;  %v628_v6 = vld [vmem:[#allocation7 + $0x20] ss:$8 sps:$4 sm:$0xff]  }
  0x39   :  { %605 = vmatpush3.bf16.msra.mxu0 %v621_v1  ;;  %v623_v3 = vld [vmem:[#allocation7 + $0x14] ss:$8 sps:$4 sm:$0xff]   ;;  %v625_v4 = vld [vmem:[#allocation7 + $0x10] ss:$8 sps:$4 sm:$0xff]   ;;  %v632_v9 = vld [vmem:[#allocation7 + $0x44] ss:$8 sps:$4 sm:$0xff]  }
  0x3a   :  { %238 = vmatprep.subr.bf16.mxu1 %v623_v3  ;;  %v629_v7 = vld [vmem:[#allocation7 + $0x34] ss:$8 sps:$4 sm:$0xff]   ;;  %v631_v8 = vld [vmem:[#allocation7 + $0x30] ss:$8 sps:$4 sm:$0xff]   ;;  %v634_v10 = vld [vmem:[#allocation7 + $0x40] ss:$8 sps:$4 sm:$0xff]  }
  0x3b   :  { %239 = vmatpush1.bf16.msra.mxu1 %v625_v4  ;;  %v635_v11 = vld [vmem:[#allocation7 + $0x54] ss:$8 sps:$4 sm:$0xff]   ;;  %v637_v12 = vld [vmem:[#allocation7 + $0x50] ss:$8 sps:$4 sm:$0xff]   ;;  %v638_v13 = vld [vmem:[#allocation7 + $0x64] ss:$8 sps:$4 sm:$0xff]  }
  0x3c   :  { %607 = vmatmul.mubr.msk.bf16.vlgmr.msra.gmra.mrb[0].mxu0 %vm82_vm1, %v622_v2  ;;  %240 = vmatprep.subr.bf16.mxu1 %v626_v5  ;;  %v640_v14 = vld [vmem:[#allocation7 + $0x60] ss:$8 sps:$4 sm:$0xff]   ;;  %v641_v15 = vld [vmem:[#allocation7 + $0x74] ss:$8 sps:$4 sm:$0xff]   ;;  %v643_v16 = vld [vmem:[#allocation7 + $0x70] ss:$8 sps:$4 sm:$0xff]  }
  0x3d   :  { %v644_v17 = vld [vmem:[#allocation7 + $0x84] ss:$8 sps:$4 sm:$0xff]   ;;  %v646_v18 = vld [vmem:[#allocation7 + $0x80] ss:$8 sps:$4 sm:$0xff]   ;;  %v766_v19 = vmov 0   ;;  %v577_v46 = vld [vmem:[#allocation5] sm:$0xff]  }
  0x3e   :  { %270 = vmatprep.mubr.bf16.mxu1 %v766_v19  ;;  %v647_v20 = vld [vmem:[#allocation7 + $0x110] ss:$8 sps:$4 sm:$0xff]   ;;  %v649_v22 = vld [vmem:[#allocation7 + $0x120] ss:$8 sps:$4 sm:$0xff]   ;;  %v578_v47 = vunpack.c.l.bf16 %v577_v46  ;;  %v579_v48 = vunpack.c.h.bf16 %v577_v46  ;;  %v575_v51 = vld [vmem:[%s879_s3 + $0x5] ss:$0 sm:$0xff] }
  0x3f   :  { %241 = vmatpush1.bf16.msra.mxu1 %v628_v6  ;;  %v648_v21 = vld [vmem:[#allocation7 + $0x90] ss:$8 sps:$4 sm:$0xff]   ;;  %582 = vmatprep.subr.bf16.mxu0 %v647_v20  ;;  %v650_v23 = vld [vmem:[#allocation7 + $0xa0] ss:$8 sps:$4 sm:$0xff]   ;;  %v149_v57 = vshrl.u32 %v148_v56, 7  ;;  %s767_s12 = smov [#allocation8]  }
  0x40   :  { %242 = vmatprep.subr.bf16.mxu1 %v629_v7  ;;  %583 = vmatpush3.bf16.msra.mxu0 %v648_v21  ;;  %v651_v24 = vld [vmem:[#allocation7 + $0x130] ss:$8 sps:$4 sm:$0xff]   ;;  %v653_v26 = vld [vmem:[#allocation7 + $0x140] ss:$8 sps:$4 sm:$0xff]   ;;  %v494_v49 = vmul.f32 -0.5, %v578_v47  ;;  %v495_v50 = vmul.f32 -0.5, %v579_v48 }
  0x41   :  { %584 = vmatprep.subr.bf16.mxu0 %v649_v22  ;;  %v652_v25 = vld [vmem:[#allocation7 + $0xb0] ss:$8 sps:$4 sm:$0xff]   ;;  %v654_v27 = vld [vmem:[#allocation7 + $0xc0] ss:$8 sps:$4 sm:$0xff]   ;;  %v150_v58 = vsub.s32 0, %v149_v57  ;;  %v154_v60 = vsub.s32 1, %v149_v57 }
  0x42   :  { %v655_v28 = vld [vmem:[#allocation7 + $0x150] ss:$8 sps:$4 sm:$0xff]   ;;  %v657_v30 = vld [vmem:[#allocation7 + $0x160] ss:$8 sps:$4 sm:$0xff]   ;;  %v496_v52 = vmul.f32 %v578_v47, %v494_v49  ;;  %v497_v53 = vmul.f32 %v579_v48, %v495_v50  ;;  %v571_v19 = vld [vmem:[%s879_s3 + $0x6] ss:$0 sm:$0xff] }
  0x43   :  { %243 = vmatpush1.bf16.msra.mxu1 %v631_v8  ;;  %v656_v29 = vld [vmem:[#allocation7 + $0xd0] ss:$8 sps:$4 sm:$0xff]   ;;  %v658_v41 = vld [vmem:[#allocation7 + $0xe0] ss:$8 sps:$4 sm:$0xff]   ;;  %s521_s1 = sshll.u32 %s767_s12, 4  ;;  %s522_s1 = int_to_ptr.vmem [resolvable:$true] %s521_s1 }
  0x44   :  { %244 = vmatprep.subr.bf16.mxu1 %v632_v9  ;;  %585 = vmatpush3.bf16.msra.mxu0 %v650_v23  ;;  %v534_v31 = vld [vmem:[%s879_s3] ss:$0 sm:$0xff]  ;;  %v661_v44 = vld [vmem:[#allocation7 + $0x180] ss:$8 sps:$4 sm:$0xff]   ;;  %v504_v54 = vadd.f32 %v575_v51, %v496_v52  ;;  %v505_v55 = vadd.f32 %v575_v51, %v497_v53  ;;  %v145_v59 = vld [vmem:[%s879_s3 + $0x1] sm:$0x3]  ;;  %p734_p11 = scmp.lt.s32.totalorder %s522_s1, %s522_s1 }
  0x45   :  { %586 = vmatprep.subr.bf16.mxu0 %v651_v24  ;;  %v659_v42 = vld [vmem:[#allocation7 + $0x170] ss:$8 sps:$4 sm:$0xff]   ;;  %v662_v45 = vld [vmem:[#allocation7 + $0x100] ss:$8 sps:$4 sm:$0xff]   ;;  %v151_v61 = vrot.slane %v145_v59, %v150_v58  ;;  %v155_v62 = vrot.slane %v145_v59, %v154_v60 }
  0x46   :  { %v660_v43 = vld [vmem:[#allocation7 + $0xf0] ss:$8 sps:$4 sm:$0xff]   ;;  %506 = vrot.lane.b32.xlu0 %v504_v54, %s760_s28 }
  0x47   :  { %245 = vmatpush1.bf16.msra.mxu1 %v634_v10 }
  0x48   :  { %246 = vmatprep.subr.bf16.mxu1 %v635_v11  ;;  %587 = vmatpush3.bf16.msra.mxu0 %v652_v25 }
  0x49   :  { %588 = vmatprep.subr.bf16.mxu0 %v653_v26 }
  0x4a   :  { %508 = vrot.lane.b32.xlu0 %v505_v55, %s760_s28 }
  0x4b   :  { %247 = vmatpush1.bf16.msra.mxu1 %v637_v12 }
  0x4c   :  { %248 = vmatprep.subr.bf16.mxu1 %v638_v13  ;;  %589 = vmatpush3.bf16.msra.mxu0 %v654_v27 }
  0x4d   :  { %590 = vmatprep.subr.bf16.mxu0 %v655_v28 }
  0x4f   :  { %249 = vmatpush1.bf16.msra.mxu1 %v640_v14  ;;  %v554_v14 = vld [vmem:[%s879_s3 + $0x3] ss:$0 sm:$0xff] }
  0x50   :  { %250 = vmatprep.subr.bf16.mxu1 %v641_v15  ;;  %591 = vmatpush3.bf16.msra.mxu0 %v656_v29 }
  0x51   :  { %592 = vmatprep.subr.bf16.mxu0 %v657_v30 }
  0x53   :  { %251 = vmatpush1.bf16.msra.mxu1 %v643_v16  ;;  %v572_v16 = vld [vmem:[%s879_s3 + $0x4] ss:$0 sm:$0xff]  ;;  %s729_s3 = scalar_lea.vmem %s522_s1, 256 }
  0x54   :  { %252 = vmatprep.subr.bf16.mxu1 %v644_v17  ;;  %593 = vmatpush3.bf16.msra.mxu0 %v658_v41  ;;  %v486_v23 = vmul.f32 %v578_v47, %v572_v16  ;;  %v487_v27 = vmul.f32 %v579_v48, %v572_v16  ;;  %p730_p10 = scmp.ne.s32.totalorder %s522_s1, %s729_s3  ;;  %p735_p12 = scmp.lt.s32.totalorder %s729_s3, %s729_s3 }
  0x55   :  { %594 = vmatprep.subr.bf16.mxu0 %v659_v42 }
  0x56   :  { %p736_p13 = por %p735_p12, %p734_p11 }
  0x57   :  { %253 = vmatpush1.bf16.msra.mxu1 %v646_v18 }
  0x58   :  { %595 = vmatpush3.bf16.msra.mxu0 %v660_v43  ;;  %p737_p0 = pnand %p736_p13, %p730_p10 }
  0x59   :  { %596 = vmatprep.subr.bf16.mxu0 %v661_v44 }
  0x5c   :  { %597 = vmatpush3.bf16.msra.mxu0 %v662_v45 }
  0xb8   :  { %v507_v24 = vpop.permute.xlu0 %506 }
 0x10f   :  { %v120_v32 = vpop.f32.mrb[0].mxu0 }
 0x110   :  { %v121_v33 = vadd.f32 %v534_v31, %v120_v32  ;;  %v608_v34 = vpop.f32.mrb[1].mxu0  ;;  %v509_v32 = vpop.permute.xlu0 %508 }
 0x111   :  { %v123_v35 = vpop.f32.mrb[2].mxu0 }
 0x112   :  { %v124_v36 = vadd.f32 %v534_v31, %v123_v35  ;;  %v609_v37 = vpop.f32.mrb[3].mxu0  ;;  %v127_v38 = vmax.f32 %v121_v33, 0.0 }
 0x114   :  { %v128_v39 = vmax.f32 %v124_v36, 0.0 }
 0x116   :  { %v146_v40 = vpack.c.bf16 %v128_v39, %v127_v38 }
 0x118   :  { %271 = vmatmul.mubr.bf16.vlgmr.msra.gmra.mrb[0].mxu1 %v146_v40 }
 0x1eb   :  { %v272_v63 = vpop.f32.mrb[0].mxu1 }
 0x1ec   :  { %v273_v0 = vadd.f32 %v272_v63, %v151_v61  ;;  %v274_v1 = vpop.f32.mrb[1].mxu1 }
 0x1ed   :  { %v275_v2 = vadd.f32 %v274_v1, %v155_v62  ;;  %v276_v3 = vpop.f32.mrb[2].mxu1 }
 0x1ee   :  { %v277_v4 = vadd.f32 %v276_v3, %v151_v61  ;;  %v278_v5 = vpop.f32.mrb[3].mxu1  ;;  %v281_v7 = vmax.f32 %v273_v0, 0.0 }
 0x1ef   :  { %v279_v6 = vadd.f32 %v278_v5, %v155_v62  ;;  %v282_v9 = vmax.f32 %v275_v2, 0.0 }
 0x1f0   :  { %v283_v8 = vmax.f32 %v277_v4, 0.0 }
 0x1f1   :  { %v284_v10 = vmax.f32 %v279_v6, 0.0 }
 0x1f2   :  { %v318_v11 = vpack.c.bf16 %v283_v8, %v281_v7 }
 0x1f3   :  { %v319_v12 = vpack.c.bf16 %v284_v10, %v282_v9 }
 0x1f5   :  { %454 = vmatprep.mubr.bf16.mxu0 %v319_v12 }
 0x1f6   :  { %455 = vmatmul.mubr.bf16.vlgmr.msra.gmra.mrb[4].mxu0 %v318_v11 }
 0x2c9   :  { %v598_v13 = vpop.f32.mrb[4].mxu0 }
 0x2ca   :  { %v599_v15 = vpop.f32.mrb[5].mxu0 }
 0x2cb   :  { %v600_v17 = vadd.f32 %v599_v15, %v598_v13  ;;  %v601_v18 = vpop.f32.mrb[6].mxu0 }
 0x2cc   :  { %v602_v20 = vpop.f32.mrb[7].mxu0 }
 0x2cd   :  { %v457_v21 = vadd.f32 %v600_v17, %v554_v14  ;;  %v603_v22 = vadd.f32 %v602_v20, %v601_v18 }
 0x2cf   :  { %v476_v25 = vmul.f32 %v571_v19, %v457_v21  ;;  %v460_v26 = vadd.f32 %v603_v22, %v554_v14 }
 0x2d1   :  { %v477_v28 = vmul.f32 %v571_v19, %v460_v26  ;;  %v488_v29 = vadd.f32 %v486_v23, %v476_v25  ;;  %v478_v33 = vsub.f32 %v457_v21, %v476_v25 }
 0x2d3   :  { %v573_v30 = vclamps-f32 %v488_v29, 1.0  ;;  %v489_v31 = vadd.f32 %v487_v27, %v477_v28  ;;  %v479_v37 = vsub.f32 %v460_v26, %v477_v28 }
 0x2d5   :  { %v510_v34 = vadd.f32 %v573_v30, %v507_v24  ;;  %v574_v35 = vclamps-f32 %v489_v31, 1.0 }
 0x2d7   :  { %v512_v36 = vadd.f32 %v510_v34, %v478_v33  ;;  %v511_v38 = vadd.f32 %v574_v35, %v509_v32 }
 0x2d9   :  { %514 = vst [vmem:[#allocation8] sm:$0xff] %v512_v36  ;;  %v513_v39 = vadd.f32 %v511_v38, %v479_v37 }
 0x2db   :  { %515 = vst [vmem:[#allocation8 + $0x8] sm:$0xff] %v513_v39 }
 0x2dc   :  { %740 = shalt.err (!%p737_p0)
}
 0x2dd   :  { %s741_s15 = scalar_lea.hbm %s880_s4, 256 }
 0x2de   :  { %p742_p1 = scmp.ne.s32.totalorder %s880_s4, %s741_s15  ;;  %p745_p2 = scmp.lt.u32.totalorder %s741_s15, %s880_s4 }
 0x2e0   :  { %p747_p3 = pnand %p745_p2, %p742_p1 }
 0x2e2   :  { %750 = shalt.err (!%p747_p3)
}
 0x2e3   :  { %527 = dma.vmem_to_hbm [thread:$0]  %s522_s1, 256, %s880_s4, [#allocation4], %s762_s0, %s762_s0, %s763_s18  }
 0x2e4   :  { %755 = dma.done.wait [#allocation4], 256  }
 0x2e5   :  { %756 = vsyncadd [#allocation4], 4294967040 }
 0x2e6   :  { %531 = vsyncpa [#allocation3], 1 }
 0x2e7   :  { %532 = vsyncpa [#allocation6], 1 }
 0x2e8   :  { %533 = vsyncpa [#allocation4], 1 }

</bundles_post_ra>
